<compile_context>
chip_gen: v7x
topology: tpu7x:2x2x1
jax: 0.10.0
libtpu: 0.0.40
codegen_flags: <defaults>
</compile_context>

<pallas_src>
import functools
from typing import NamedTuple

import jax
import jax.numpy as jnp
from jax.experimental import pallas as pl
from jax.experimental.pallas import tpu as pltpu

_LANE = 128
_SUBLANE = 8
_SMALL_M_ROWS = 4096  # below this, XLA's fused dot+bias beats a pallas_call


class GaussianActionDist(NamedTuple):
    """Parameters of the Normal returned by GaussianAction.forward."""
    loc: jax.Array    # (..., size_out)
    scale: jax.Array  # (1, size_out)


# ---------------------------------------------------------------------------
# Kernel: fused  out = x @ W + b   (bias added on the f32 accumulator)
# ---------------------------------------------------------------------------
def _linear_bias_kernel(x_ref, w_ref, b_ref, o_ref):
    # x_ref: (tm, K), w_ref: (K, N), b_ref: (1, N), o_ref: (tm, N)
    acc = jnp.dot(x_ref[...], w_ref[...], preferred_element_type=jnp.float32)
    o_ref[...] = (acc + b_ref[...].astype(jnp.float32)).astype(o_ref.dtype)


# ---------------------------------------------------------------------------
# Tiling / layout helpers (all static, shape-level Python)
# ---------------------------------------------------------------------------
def _cdiv(a, b):
    return -(-a // b)


def _round_up(a, b):
    return _cdiv(a, b) * b


def _tpu_kind():
    try:
        return jax.devices()[0].device_kind.lower()
    except Exception:  # pragma: no cover - CPU/interpret fallback
        return ""


def _vmem_budget_bytes(kind):
    # Stay inside the scoped-VMEM *defaults* (no vmem_limit_bytes override):
    #   v5e: 16 MiB scoped default -> budget 12 MiB
    #   v6e/v7x: 32 MiB scoped default -> budget 24 MiB (v7x physical is 64 MiB,
    #   so do not go higher there either).
    if "v6" in kind or "v7" in kind:
        return 24 << 20
    return 12 << 20  # conservative default (v5e and anything unrecognized)


def _min_grid_steps(kind):
    # v7x has 2 TensorCores: need >=2 (ideally >=4) grid steps for the
    # "parallel" row axis to shard across them.  >=2 elsewhere just gives the
    # pipeliner something to overlap.
    return 4 if "v7" in kind else 2


def _pick_row_tile(m_rows, k, n, itemsize, *, budget_bytes, min_steps):
    """Row tile sized from LANE-PADDED VMEM bytes: x & out blocks are
    double-buffered; the (constant-index) weight and bias blocks are charged
    with 2 buffers as well."""
    kp = _round_up(k, _LANE)
    np_ = _round_up(n, _LANE)
    per_row = (kp + np_) * itemsize                          # padded x row + out row
    resident = (kp * np_ + _SUBLANE * np_) * itemsize * 2    # W + bias, 2 buffers
    budget = max(budget_bytes - resident, 2 * per_row * _SUBLANE)
    tm = budget // (2 * per_row)                             # double-buffered x/out
    # Keep at least `min_steps` grid steps when there is enough work.
    tm = min(tm, max(_SUBLANE, _cdiv(m_rows, min_steps)))
    tm = max(_SUBLANE, (tm // _SUBLANE) * _SUBLANE)          # sublane alignment
    if tm >= m_rows:
        tm = m_rows                                          # full-dim block is legal
    return tm


def _pack_factor(k, n):
    """How many logical rows to pack into one 128-lane row (1 = no packing)."""
    if n >= _LANE:
        return 1
    p = _LANE // n                              # lane-dense output rows
    p = min(p, max(1, 2048 // max(k, 1)))       # keep packed K manageable
    return max(1, p)


def _fused_linear_pallas(x2, w, b_row, *, tile_rows=None):
    """(M, K) @ (K, N) + (1, N) -> (M, N), fused bias-add in the epilogue."""
    m, k = x2.shape
    n = w.shape[1]
    kind = _tpu_kind()
    if tile_rows is None:
        tm = _pick_row_tile(m, k, n, x2.dtype.itemsize,
                            budget_bytes=_vmem_budget_bytes(kind),
                            min_steps=_min_grid_steps(kind))
    else:
        tm = min(int(tile_rows), m)
        if tm < m:
            tm = max(_SUBLANE, (tm // _SUBLANE) * _SUBLANE)
    grid_m = _cdiv(m, tm)

    return pl.pallas_call(
        _linear_bias_kernel,
        out_shape=jax.ShapeDtypeStruct((m, n), x2.dtype),
        grid=(grid_m,),
        in_specs=[
            pl.BlockSpec((tm, k), lambda i: (i, 0)),   # x row tile (pipelined)
            pl.BlockSpec((k, n), lambda i: (0, 0)),    # whole weight, resident
            pl.BlockSpec((1, n), lambda i: (0, 0)),    # bias, resident
        ],
        out_specs=pl.BlockSpec((tm, n), lambda i: (i, 0)),
        compiler_params=pltpu.CompilerParams(
            dimension_semantics=("parallel",)),        # v7x: shard rows over 2 TCs
    )(x2, w, b_row)


# ---------------------------------------------------------------------------
# Wrapper mirroring GaussianAction.forward
# ---------------------------------------------------------------------------
@functools.partial(jax.jit, static_argnames=("tile_rows", "use_pallas"))
def gaussian_action_forward(x, weight, bias, logstd, *, tile_rows=None,
                            use_pallas=None):
    """x: (..., size_in); weight: (size_out, size_in); bias: (size_out,);
    logstd: (1, size_out).  Returns GaussianActionDist(loc, scale)."""
    size_out, size_in = weight.shape
    lead = x.shape[:-1]
    x2 = x.reshape(-1, size_in)
    m, k = x2.shape
    n = size_out
    dtype = x2.dtype

    wT = weight.T.astype(dtype)            # (K, N)
    b_row = bias.reshape(1, n).astype(dtype)

    if use_pallas is None:
        # Small problems: launch + DMA setup dominate a pallas_call; XLA fuses
        # the bias-add into the dot anyway.
        use_pallas = m >= _SMALL_M_ROWS

    if not use_pallas:
        acc = jnp.dot(x2, wT, preferred_element_type=jnp.float32)
        mean2 = (acc + b_row.astype(jnp.float32)).astype(dtype)
    else:
        p = _pack_factor(k, n)
        if p > 1:
            # Lane-dense packing: p logical rows per 128-lane row.
            m_pad = _round_up(m, p)
            if m_pad != m:
                x2 = jnp.pad(x2, ((0, m_pad - m), (0, 0)))   # zero rows -> trimmed below
            xp = x2.reshape(m_pad // p, p * k)               # free row-major reshape
            # Block-diagonal weight (p*k, p*n) and tiled bias (1, p*n). Tiny
            # (e.g. 1024x128); hoist outside the step if weight is static.
            w_bd = jnp.kron(jnp.eye(p, dtype=dtype), wT)
            b_bd = jnp.tile(b_row, (1, p))
            outp = _fused_linear_pallas(xp, w_bd, b_bd, tile_rows=tile_rows)
            mean2 = outp.reshape(m_pad, n)[:m]               # free reshape + trim pad
        else:
            mean2 = _fused_linear_pallas(x2, wT, b_row, tile_rows=tile_rows)

    mean = mean2.reshape(*lead, n)

    # self.logstd.exp(): (1, size_out) constant -- trivial wrapper-side op; a
    # standalone Pallas kernel for it would be pure overhead.
    scale = jnp.exp(logstd)
    # TODO(synk): sampling / log_prob of the Normal live outside the forward
    # kernel; the distribution is returned as its (loc, scale) parameters.
    return GaussianActionDist(loc=mean, scale=scale)


if __name__ == "__main__":
    key = jax.random.PRNGKey(0)
    k_w, k_x, k_xb = jax.random.split(key, 3)

    size_in, size_out, batch, std = 32, 4, 8, 0.5

    # Deterministic parameters mirroring the module __init__:
    #   nn.Linear default init (uniform +-1/sqrt(size_in)), weights *= 0.1,
    #   bias *= 0.0, logstd = log(ones(1, size_out) * std).
    lim = 1.0 / (size_in ** 0.5)
    weight = jax.random.uniform(
        k_w, (size_out, size_in), jnp.float32, minval=-lim, maxval=lim) * 0.1
    bias = jnp.zeros((size_out,), jnp.float32)
    logstd = jnp.log(jnp.ones((1, size_out), jnp.float32) * std)

    # Small forward pass, forcing the Pallas (packed, lane-dense) path.
    x = jax.random.normal(k_x, (batch, size_in), jnp.float32)
    dist = gaussian_action_forward(x, weight, bias, logstd, use_pallas=True)
    loc = jax.block_until_ready(dist.loc)
    ref = x @ weight.T + bias
    assert loc.shape == (batch, size_out) and loc.dtype == x.dtype
    assert jnp.allclose(loc, ref, atol=1e-5, rtol=1e-5), "mean mismatch (small)"
    assert jnp.allclose(dist.scale, jnp.full((1, size_out), std, jnp.float32),
                        atol=1e-6), "scale mismatch"

    # Auto dispatch (small m -> fused jnp path), same numerics.
    dist_auto = gaussian_action_forward(x, weight, bias, logstd)
    assert jnp.allclose(jax.block_until_ready(dist_auto.loc), ref,
                        atol=1e-5, rtol=1e-5), "mean mismatch (auto dispatch)"

    # Larger, non-multiple-of-32 batch through the Pallas path: exercises the
    # pad-to-pack step, multi-step grid, and masked ragged last block.
    xb = jax.random.normal(k_xb, (1100, size_in), jnp.float32)
    distb = gaussian_action_forward(xb, weight, bias, logstd, use_pallas=True)
    locb = jax.block_until_ready(distb.loc)
    refb = xb @ weight.T + bias
    assert jnp.allclose(locb, refb, atol=1e-5, rtol=1e-5), "mean mismatch (tiled)"

    # Explicit tiny packed-row tile to force a multi-step ragged grid.
    distc = gaussian_action_forward(xb, weight, bias, logstd,
                                    use_pallas=True, tile_rows=8)
    assert jnp.allclose(jax.block_until_ready(distc.loc), refb,
                        atol=1e-5, rtol=1e-5), "mean mismatch (forced tile)"

    print("KERNEL_OK")
</pallas_src>

<mosaic_0001>
module attributes {stable_mosaic.version = 11 : i64} {
  func.func @_linear_bias_kernel(%arg0: i32, %arg1: memref<1x1024xf32, #tpu.memory_space<vmem>>, %arg2: memref<1024x128xf32, #tpu.memory_space<vmem>>, %arg3: memref<1x128xf32, #tpu.memory_space<vmem>>, %arg4: memref<1x128xf32, #tpu.memory_space<vmem>>) attributes {dimension_semantics = [#tpu.dimension_semantics<parallel>], iteration_bounds = array<i64: 1>, scalar_prefetch = 0 : i64, scratch_operands = 0 : i64, tpu.core_type = #tpu.core_type<tc>, window_params = [{transform_indices = @transform_0, window_bounds = array<i64: 1, 1024>}, {pipeline_mode = #tpu.pipeline_mode<synchronous>, transform_indices = @transform_1, window_bounds = array<i64: 1024, 128>}, {pipeline_mode = #tpu.pipeline_mode<synchronous>, transform_indices = @transform_2, window_bounds = array<i64: 1, 128>}, {transform_indices = @transform_3, window_bounds = array<i64: 1, 128>}]} {
    %c0 = arith.constant 0 : index
    %c0_0 = arith.constant 0 : index
    %0 = vector.load %arg1[%c0, %c0_0] : memref<1x1024xf32, #tpu.memory_space<vmem>>, vector<1x1024xf32>
    %c0_1 = arith.constant 0 : index
    %c0_2 = arith.constant 0 : index
    %1 = vector.load %arg2[%c0_1, %c0_2] : memref<1024x128xf32, #tpu.memory_space<vmem>>, vector<1024x128xf32>
    %cst = arith.constant dense<0.000000e+00> : vector<1x128xf32>
    %2 = tpu.matmul %0, %1, %cst {dimension_numbers = #tpu.dot_dimension_numbers<[1], [0], [0], [1], [0, 0, 1, 1], [], []>} : vector<1x1024xf32>, vector<1024x128xf32>, vector<1x128xf32> -> vector<1x128xf32>
    %c0_3 = arith.constant 0 : index
    %c0_4 = arith.constant 0 : index
    %3 = vector.load %arg3[%c0_3, %c0_4] : memref<1x128xf32, #tpu.memory_space<vmem>>, vector<1x128xf32>
    %4 = arith.addf %2, %3 : vector<1x128xf32>
    %c0_5 = arith.constant 0 : index
    %c0_6 = arith.constant 0 : index
    %5 = vector.load %arg4[%c0_5, %c0_6] : memref<1x128xf32, #tpu.memory_space<vmem>>, vector<1x128xf32>
    tpu.vector_store %arg4[%c0_5, %c0_6], %4 {strides = array<i32>} : memref<1x128xf32, #tpu.memory_space<vmem>>, vector<1x128xf32>,
    return
  }
  func.func @transform_0(%arg0: i32) -> (i32, i32) {
    %c0_i32 = arith.constant 0 : i32
    %c0_i32_0 = arith.constant 0 : i32
    return %arg0, %c0_i32 : i32, i32
  }
  func.func @transform_1(%arg0: i32) -> (i32, i32) {
    %c0_i32 = arith.constant 0 : i32
    %c0_i32_0 = arith.constant 0 : i32
    %c0_i32_1 = arith.constant 0 : i32
    return %c0_i32, %c0_i32_0 : i32, i32
  }
  func.func @transform_2(%arg0: i32) -> (i32, i32) {
    %c0_i32 = arith.constant 0 : i32
    %c0_i32_0 = arith.constant 0 : i32
    %c0_i32_1 = arith.constant 0 : i32
    return %c0_i32, %c0_i32_0 : i32, i32
  }
  func.func @transform_3(%arg0: i32) -> (i32, i32) {
    %c0_i32 = arith.constant 0 : i32
    %c0_i32_0 = arith.constant 0 : i32
    return %arg0, %c0_i32 : i32, i32
  }
}

</mosaic_0001>

<bundles_post_ra>
// kernel: gaussian_action_forward.1
= control target key start
LH: loop header
LB: loop body
LE: loop exit
PB: predicated region body
PF: predicated region fallthrough
CT: control target
= control target key end

     0   :  { %v145_v47 = vlaneseq  ;;  %s1171_s1 = inlined_call_operand.vmem [shape: f32[1024,128], index: 1, kind: input, shape index: {}]   ;;  %s1172_s0 = inlined_call_operand.vmem [shape: f32[1,1024], index: 0, kind: input, shape index: {}]   ;;  %s1173_s2 = inlined_call_operand.vmem [shape: f32[1,128], index: 2, kind: input, shape index: {}]   ;;  %s1174_s3 = inlined_call_operand.vmem [shape: f32[1,128], index: 3, kind: output, shape index: {}]  }
   0x1   :  { %v31_v0 = vld [vmem:[%s1171_s1 + $0x80] sm:$0xff]  ;;  %v32_v1 = vld [vmem:[%s1171_s1 + $0x88] sm:$0xff]  ;;  %v33_v11 = vld [vmem:[%s1171_s1 + $0x90] sm:$0xff] }
   0x2   :  { %v15_v2 = vld [vmem:[%s1171_s1] sm:$0xff]  ;;  %v610_v3 = vpack.c.bf16 %v32_v1, %v31_v0  ;;  %v16_v4 = vld [vmem:[%s1171_s1 + $0x8] sm:$0xff]  ;;  %v34_v13 = vld [vmem:[%s1171_s1 + $0x98] sm:$0xff]  ;;  %v884_v61 = vshrl.u32 %v145_v47, 7 }
   0x3   :  { %v63_v5 = vld [vmem:[%s1171_s1 + $0x180] sm:$0xff]  ;;  %v64_v6 = vld [vmem:[%s1171_s1 + $0x188] sm:$0xff]  ;;  %v612_v7 = vpack.c.bf16 %v16_v4, %v15_v2  ;;  %v17_v14 = vld [vmem:[%s1171_s1 + $0x10] sm:$0xff]  ;;  %v614_v16 = vpack.c.bf16 %v34_v13, %v33_v11 }
   0x4   :  { %v642_v8 = vpack.c.bf16 %v64_v6, %v63_v5  ;;  %v47_v9 = vld [vmem:[%s1171_s1 + $0x100] sm:$0xff]  ;;  %v48_v10 = vld [vmem:[%s1171_s1 + $0x108] sm:$0xff]  ;;  %611 = vmatprep.subr.bf16.mxu0 %v610_v3  ;;  %v18_v15 = vld [vmem:[%s1171_s1 + $0x18] sm:$0xff]  ;;  %v159_v11 = vsub.s32 3, %v884_v61 }
   0x5   :  { %v644_v12 = vpack.c.bf16 %v48_v10, %v47_v9  ;;  %613 = vmatpush3.bf16.msra.mxu0 %v612_v7  ;;  %v616_v17 = vpack.c.bf16 %v18_v15, %v17_v14  ;;  %v65_v18 = vld [vmem:[%s1171_s1 + $0x190] sm:$0xff]  ;;  %v66_v19 = vld [vmem:[%s1171_s1 + $0x198] sm:$0xff]  ;;  %v35_v23 = vld [vmem:[%s1171_s1 + $0xa0] sm:$0xff]  ;;  %v151_v10 = vsub.s32 1, %v884_v61 }
   0x6   :  { %643 = vmatprep.subr.bf16.mxu1 %v642_v8  ;;  %v49_v20 = vld [vmem:[%s1171_s1 + $0x110] sm:$0xff]  ;;  %v646_v21 = vpack.c.bf16 %v66_v19, %v65_v18  ;;  %v50_v22 = vld [vmem:[%s1171_s1 + $0x118] sm:$0xff]  ;;  %v36_v24 = vld [vmem:[%s1171_s1 + $0xa8] sm:$0xff]  ;;  %615 = vmatprep.subr.bf16.mxu0 %v614_v16 }
   0x7   :  { %645 = vmatpush3.bf16.msra.mxu1 %v644_v12  ;;  %v648_v25 = vpack.c.bf16 %v50_v22, %v49_v20  ;;  %v618_v26 = vpack.c.bf16 %v36_v24, %v35_v23  ;;  %v19_v27 = vld [vmem:[%s1171_s1 + $0x20] sm:$0xff]  ;;  %v20_v28 = vld [vmem:[%s1171_s1 + $0x28] sm:$0xff]  ;;  %v37_v35 = vld [vmem:[%s1171_s1 + $0xb0] sm:$0xff] }
   0x8   :  { %v67_v29 = vld [vmem:[%s1171_s1 + $0x1a0] sm:$0xff]  ;;  %647 = vmatprep.subr.bf16.mxu1 %v646_v21  ;;  %v68_v30 = vld [vmem:[%s1171_s1 + $0x1a8] sm:$0xff]  ;;  %v620_v33 = vpack.c.bf16 %v20_v28, %v19_v27  ;;  %v38_v36 = vld [vmem:[%s1171_s1 + $0xb8] sm:$0xff] }
   0x9   :  { %v51_v31 = vld [vmem:[%s1171_s1 + $0x120] sm:$0xff]  ;;  %v52_v32 = vld [vmem:[%s1171_s1 + $0x128] sm:$0xff]  ;;  %617 = vmatpush3.bf16.msra.mxu0 %v616_v17  ;;  %v650_v34 = vpack.c.bf16 %v68_v30, %v67_v29  ;;  %v21_v37 = vld [vmem:[%s1171_s1 + $0x30] sm:$0xff]  ;;  %v622_v39 = vpack.c.bf16 %v38_v36, %v37_v35 }
   0xa   :  { %619 = vmatprep.subr.bf16.mxu0 %v618_v26  ;;  %v652_v38 = vpack.c.bf16 %v52_v32, %v51_v31  ;;  %v22_v40 = vld [vmem:[%s1171_s1 + $0x38] sm:$0xff]  ;;  %v69_v41 = vld [vmem:[%s1171_s1 + $0x1b0] sm:$0xff]  ;;  %v39_v46 = vld [vmem:[%s1171_s1 + $0xc0] sm:$0xff] }
   0xb   :  { %649 = vmatpush3.bf16.msra.mxu1 %v648_v25  ;;  %v70_v42 = vld [vmem:[%s1171_s1 + $0x1b8] sm:$0xff]  ;;  %v53_v44 = vld [vmem:[%s1171_s1 + $0x130] sm:$0xff]  ;;  %v40_v48 = vld [vmem:[%s1171_s1 + $0xc8] sm:$0xff]  ;;  %v624_v49 = vpack.c.bf16 %v22_v40, %v21_v37 }
   0xc   :  { %651 = vmatprep.subr.bf16.mxu1 %v650_v34  ;;  %v654_v43 = vpack.c.bf16 %v70_v42, %v69_v41  ;;  %v54_v45 = vld [vmem:[%s1171_s1 + $0x138] sm:$0xff]  ;;  %v71_v50 = vld [vmem:[%s1171_s1 + $0x1c0] sm:$0xff]  ;;  %v72_v51 = vld [vmem:[%s1171_s1 + $0x1c8] sm:$0xff]  ;;  %v626_v53 = vpack.c.bf16 %v40_v48, %v39_v46 }
   0xd   :  { %621 = vmatpush3.bf16.msra.mxu0 %v620_v33  ;;  %v656_v52 = vpack.c.bf16 %v54_v45, %v53_v44  ;;  %v23_v54 = vld [vmem:[%s1171_s1 + $0x40] sm:$0xff]  ;;  %v24_v55 = vld [vmem:[%s1171_s1 + $0x48] sm:$0xff]  ;;  %v658_v57 = vpack.c.bf16 %v72_v51, %v71_v50  ;;  %v41_v59 = vld [vmem:[%s1171_s1 + $0xd0] sm:$0xff] }
   0xe   :  { %623 = vmatprep.subr.bf16.mxu0 %v622_v39  ;;  %v55_v56 = vld [vmem:[%s1171_s1 + $0x140] sm:$0xff]  ;;  %v56_v58 = vld [vmem:[%s1171_s1 + $0x148] sm:$0xff]  ;;  %v42_v60 = vld [vmem:[%s1171_s1 + $0xd8] sm:$0xff]  ;;  %v628_v0 = vpack.c.bf16 %v24_v55, %v23_v54  ;;  %v147_v39 = vsub.s32 0, %v884_v61 }
   0xf   :  { %653 = vmatpush3.bf16.msra.mxu1 %v652_v38  ;;  %v73_v62 = vld [vmem:[%s1171_s1 + $0x1d0] sm:$0xff]  ;;  %v74_v63 = vld [vmem:[%s1171_s1 + $0x1d8] sm:$0xff]  ;;  %v660_v1 = vpack.c.bf16 %v56_v58, %v55_v56  ;;  %v630_v2 = vpack.c.bf16 %v42_v60, %v41_v59  ;;  %v43_v8 = vld [vmem:[%s1171_s1 + $0xe0] sm:$0xff] }
  0x10   :  { %655 = vmatprep.subr.bf16.mxu1 %v654_v43  ;;  %v25_v3 = vld [vmem:[%s1171_s1 + $0x50] sm:$0xff]  ;;  %v26_v4 = vld [vmem:[%s1171_s1 + $0x58] sm:$0xff]  ;;  %v662_v6 = vpack.c.bf16 %v74_v63, %v73_v62  ;;  %v44_v9 = vld [vmem:[%s1171_s1 + $0xe8] sm:$0xff]  ;;  %v155_v43 = vsub.s32 2, %v884_v61 }
  0x11   :  { %625 = vmatpush3.bf16.msra.mxu0 %v624_v49  ;;  %v57_v5 = vld [vmem:[%s1171_s1 + $0x150] sm:$0xff]  ;;  %v58_v7 = vld [vmem:[%s1171_s1 + $0x158] sm:$0xff]  ;;  %v75_v12 = vld [vmem:[%s1171_s1 + $0x1e0] sm:$0xff]  ;;  %v632_v14 = vpack.c.bf16 %v26_v4, %v25_v3  ;;  %v634_v17 = vpack.c.bf16 %v44_v9, %v43_v8 }
  0x12   :  { %627 = vmatprep.subr.bf16.mxu0 %v626_v53  ;;  %v76_v13 = vld [vmem:[%s1171_s1 + $0x1e8] sm:$0xff]  ;;  %v27_v15 = vld [vmem:[%s1171_s1 + $0x60] sm:$0xff]  ;;  %v664_v16 = vpack.c.bf16 %v58_v7, %v57_v5  ;;  %v45_v23 = vld [vmem:[%s1171_s1 + $0xf0] sm:$0xff]  ;;  %v167_v53 = vsub.s32 5, %v884_v61 }
  0x13   :  { %657 = vmatpush3.bf16.msra.mxu1 %v656_v52  ;;  %v28_v18 = vld [vmem:[%s1171_s1 + $0x68] sm:$0xff]  ;;  %v59_v19 = vld [vmem:[%s1171_s1 + $0x160] sm:$0xff]  ;;  %v666_v21 = vpack.c.bf16 %v76_v13, %v75_v12  ;;  %v46_v24 = vld [vmem:[%s1171_s1 + $0xf8] sm:$0xff] }
  0x14   :  { %659 = vmatprep.subr.bf16.mxu1 %v658_v57  ;;  %v930_v20 = vld [vmem:[%s1172_s0] sm:$0xff]  ;;  %v60_v22 = vld [vmem:[%s1171_s1 + $0x168] sm:$0xff]  ;;  %v77_v27 = vld [vmem:[%s1171_s1 + $0x1f0] sm:$0xff]  ;;  %v636_v29 = vpack.c.bf16 %v28_v18, %v27_v15  ;;  %v638_v31 = vpack.c.bf16 %v46_v24, %v45_v23  ;;  %v175_v57 = vsub.s32 7, %v884_v61 }
  0x15   :  { %629 = vmatpush3.bf16.msra.mxu0 %v628_v0  ;;  %v152_v25 = vrot.slane %v930_v20, %v151_v10  ;;  %v160_v26 = vrot.slane %v930_v20, %v159_v11  ;;  %v78_v28 = vld [vmem:[%s1171_s1 + $0x1f8] sm:$0xff]  ;;  %v668_v30 = vpack.c.bf16 %v60_v22, %v59_v19  ;;  %v29_v32 = vld [vmem:[%s1171_s1 + $0x70] sm:$0xff]  ;;  %v95_v37 = vld [vmem:[%s1171_s1 + $0x280] sm:$0xff]  ;;  %v148_v54 = vrot.slane %v930_v20, %v147_v39 }
  0x16   :  { %631 = vmatprep.subr.bf16.mxu0 %v630_v2  ;;  %v30_v33 = vld [vmem:[%s1171_s1 + $0x78] sm:$0xff]  ;;  %v61_v34 = vld [vmem:[%s1171_s1 + $0x170] sm:$0xff]  ;;  %v670_v35 = vpack.c.bf16 %v78_v28, %v77_v27  ;;  %v96_v38 = vld [vmem:[%s1171_s1 + $0x288] sm:$0xff]  ;;  %v156_v59 = vrot.slane %v930_v20, %v155_v43  ;;  %v176_v9 = vrot.slane %v930_v20, %v175_v57 }
  0x17   :  { %661 = vmatpush3.bf16.msra.mxu1 %v660_v1  ;;  %249 = vmatprep.mubr.f32.mxu0 %v152_v25  ;;  %v62_v36 = vld [vmem:[%s1171_s1 + $0x178] sm:$0xff]  ;;  %v127_v40 = vld [vmem:[%s1171_s1 + $0x380] sm:$0xff]  ;;  %v128_v41 = vld [vmem:[%s1171_s1 + $0x388] sm:$0xff]  ;;  %v640_v42 = vpack.c.bf16 %v30_v33, %v29_v32  ;;  %v674_v45 = vpack.c.bf16 %v96_v38, %v95_v37 }
  0x18   :  { %663 = vmatprep.subr.bf16.mxu1 %v662_v6  ;;  %319 = vmatprep.mubr.f32.mxu1 %v160_v26  ;;  %v672_v44 = vpack.c.bf16 %v62_v36, %v61_v34  ;;  %v79_v46 = vld [vmem:[%s1171_s1 + $0x200] sm:$0xff]  ;;  %v80_v47 = vld [vmem:[%s1171_s1 + $0x208] sm:$0xff]  ;;  %v706_v49 = vpack.c.bf16 %v128_v41, %v127_v40  ;;  %v97_v51 = vld [vmem:[%s1171_s1 + $0x290] sm:$0xff]  ;;  %v168_v6 = vrot.slane %v930_v20, %v167_v53 }
  0x19   :  { %633 = vmatpush3.bf16.msra.mxu0 %v632_v14  ;;  %v111_v48 = vld [vmem:[%s1171_s1 + $0x300] sm:$0xff]  ;;  %v112_v50 = vld [vmem:[%s1171_s1 + $0x308] sm:$0xff]  ;;  %v98_v52 = vld [vmem:[%s1171_s1 + $0x298] sm:$0xff]  ;;  %v676_v58 = vpack.c.bf16 %v80_v47, %v79_v46 }
  0x1a   :  { %635 = vmatprep.subr.bf16.mxu0 %v634_v17  ;;  %v129_v55 = vld [vmem:[%s1171_s1 + $0x390] sm:$0xff]  ;;  %v130_v56 = vld [vmem:[%s1171_s1 + $0x398] sm:$0xff]  ;;  %v708_v60 = vpack.c.bf16 %v112_v50, %v111_v48  ;;  %v678_v62 = vpack.c.bf16 %v98_v52, %v97_v51  ;;  %v99_v4 = vld [vmem:[%s1171_s1 + $0x2a0] sm:$0xff] }
  0x1b   :  { %665 = vmatpush3.bf16.msra.mxu1 %v664_v16  ;;  %v81_v63 = vld [vmem:[%s1171_s1 + $0x210] sm:$0xff]  ;;  %v82_v0 = vld [vmem:[%s1171_s1 + $0x218] sm:$0xff]  ;;  %v710_v2 = vpack.c.bf16 %v130_v56, %v129_v55  ;;  %v100_v5 = vld [vmem:[%s1171_s1 + $0x2a8] sm:$0xff] }
  0x1c   :  { %667 = vmatprep.subr.bf16.mxu1 %v666_v21  ;;  %v113_v1 = vld [vmem:[%s1171_s1 + $0x310] sm:$0xff]  ;;  %v114_v3 = vld [vmem:[%s1171_s1 + $0x318] sm:$0xff]  ;;  %v131_v7 = vld [vmem:[%s1171_s1 + $0x3a0] sm:$0xff]  ;;  %v680_v10 = vpack.c.bf16 %v82_v0, %v81_v63  ;;  %v682_v12 = vpack.c.bf16 %v100_v5, %v99_v4 }
  0x1d   :  { %637 = vmatpush3.bf16.msra.mxu0 %v636_v29  ;;  %v132_v8 = vld [vmem:[%s1171_s1 + $0x3a8] sm:$0xff]  ;;  %v712_v11 = vpack.c.bf16 %v114_v3, %v113_v1  ;;  %v83_v13 = vld [vmem:[%s1171_s1 + $0x220] sm:$0xff]  ;;  %v101_v18 = vld [vmem:[%s1171_s1 + $0x2b0] sm:$0xff] }
  0x1e   :  { %639 = vmatprep.subr.bf16.mxu0 %v638_v31  ;;  %v84_v14 = vld [vmem:[%s1171_s1 + $0x228] sm:$0xff]  ;;  %v115_v15 = vld [vmem:[%s1171_s1 + $0x320] sm:$0xff]  ;;  %v714_v16 = vpack.c.bf16 %v132_v8, %v131_v7  ;;  %v102_v19 = vld [vmem:[%s1171_s1 + $0x2b8] sm:$0xff] }
  0x1f   :  { %669 = vmatpush3.bf16.msra.mxu1 %v668_v30  ;;  %v116_v17 = vld [vmem:[%s1171_s1 + $0x328] sm:$0xff]  ;;  %v133_v21 = vld [vmem:[%s1171_s1 + $0x3b0] sm:$0xff]  ;;  %v134_v22 = vld [vmem:[%s1171_s1 + $0x3b8] sm:$0xff]  ;;  %v684_v23 = vpack.c.bf16 %v84_v14, %v83_v13  ;;  %v686_v25 = vpack.c.bf16 %v102_v19, %v101_v18  ;;  %v171_v18 = vsub.s32 6, %v884_v61 }
  0x20   :  { %671 = vmatprep.subr.bf16.mxu1 %v670_v35  ;;  %v716_v24 = vpack.c.bf16 %v116_v17, %v115_v15  ;;  %v85_v26 = vld [vmem:[%s1171_s1 + $0x230] sm:$0xff]  ;;  %v86_v27 = vld [vmem:[%s1171_s1 + $0x238] sm:$0xff]  ;;  %v718_v29 = vpack.c.bf16 %v134_v22, %v133_v21  ;;  %v103_v31 = vld [vmem:[%s1171_s1 + $0x2c0] sm:$0xff] }
  0x21   :  { %641 = vmatpush3.bf16.msra.mxu0 %v640_v42  ;;  %v117_v28 = vld [vmem:[%s1171_s1 + $0x330] sm:$0xff]  ;;  %v118_v30 = vld [vmem:[%s1171_s1 + $0x338] sm:$0xff]  ;;  %v104_v32 = vld [vmem:[%s1171_s1 + $0x2c8] sm:$0xff]  ;;  %v688_v35 = vpack.c.bf16 %v86_v27, %v85_v26  ;;  %v172_v22 = vrot.slane %v930_v20, %v171_v18 }
  0x22   :  { %675 = vmatprep.subr.bf16.mxu0 %v674_v45  ;;  %v135_v33 = vld [vmem:[%s1171_s1 + $0x3c0] sm:$0xff]  ;;  %v136_v34 = vld [vmem:[%s1171_s1 + $0x3c8] sm:$0xff]  ;;  %v720_v36 = vpack.c.bf16 %v118_v30, %v117_v28  ;;  %v690_v37 = vpack.c.bf16 %v104_v32, %v103_v31  ;;  %v105_v43 = vld [vmem:[%s1171_s1 + $0x2d0] sm:$0xff] }
  0x23   :  { %673 = vmatpush3.bf16.msra.mxu1 %v672_v44  ;;  %v87_v38 = vld [vmem:[%s1171_s1 + $0x240] sm:$0xff]  ;;  %v88_v39 = vld [vmem:[%s1171_s1 + $0x248] sm:$0xff]  ;;  %v722_v41 = vpack.c.bf16 %v136_v34, %v135_v33  ;;  %v106_v44 = vld [vmem:[%s1171_s1 + $0x2d8] sm:$0xff] }
  0x24   :  { %707 = vmatprep.subr.bf16.mxu1 %v706_v49  ;;  %250 = vmatmul.mubr.f32.vlgmr.msra.gmra.mrb[0].mxu0 %v148_v54  ;;  %v119_v40 = vld [vmem:[%s1171_s1 + $0x340] sm:$0xff]  ;;  %v120_v42 = vld [vmem:[%s1171_s1 + $0x348] sm:$0xff]  ;;  %v137_v45 = vld [vmem:[%s1171_s1 + $0x3d0] sm:$0xff]  ;;  %v692_v47 = vpack.c.bf16 %v88_v39, %v87_v38  ;;  %v694_v49 = vpack.c.bf16 %v106_v44, %v105_v43 }
  0x25   :  { %677 = vmatpush3.bf16.msra.mxu0 %v676_v58  ;;  %389 = vmatprep.mubr.f32.mxu0 %v168_v6  ;;  %v138_v46 = vld [vmem:[%s1171_s1 + $0x3d8] sm:$0xff]  ;;  %v724_v48 = vpack.c.bf16 %v120_v42, %v119_v40  ;;  %v89_v50 = vld [vmem:[%s1171_s1 + $0x250] sm:$0xff]  ;;  %v107_v55 = vld [vmem:[%s1171_s1 + $0x2e0] sm:$0xff] }
  0x26   :  { %320 = vmatmul.mubr.f32.vlgmr.msra.gmra.mrb[0].mxu1 %v156_v59  ;;  %679 = vmatprep.subr.bf16.mxu0 %v678_v62  ;;  %v90_v51 = vld [vmem:[%s1171_s1 + $0x258] sm:$0xff]  ;;  %v121_v52 = vld [vmem:[%s1171_s1 + $0x350] sm:$0xff]  ;;  %v726_v53 = vpack.c.bf16 %v138_v46, %v137_v45  ;;  %v108_v56 = vld [vmem:[%s1171_s1 + $0x2e8] sm:$0xff] }
  0x27   :  { %709 = vmatpush3.bf16.msra.mxu1 %v708_v60  ;;  %459 = vmatprep.mubr.f32.mxu1 %v176_v9  ;;  %v122_v54 = vld [vmem:[%s1171_s1 + $0x358] sm:$0xff]  ;;  %v139_v57 = vld [vmem:[%s1171_s1 + $0x3e0] sm:$0xff]  ;;  %v140_v58 = vld [vmem:[%s1171_s1 + $0x3e8] sm:$0xff]  ;;  %v696_v59 = vpack.c.bf16 %v90_v51, %v89_v50  ;;  %v698_v62 = vpack.c.bf16 %v108_v56, %v107_v55 }
  0x28   :  { %711 = vmatprep.subr.bf16.mxu1 %v710_v2  ;;  %v728_v60 = vpack.c.bf16 %v122_v54, %v121_v52  ;;  %v91_v63 = vld [vmem:[%s1171_s1 + $0x260] sm:$0xff]  ;;  %v92_v0 = vld [vmem:[%s1171_s1 + $0x268] sm:$0xff]  ;;  %v730_v2 = vpack.c.bf16 %v140_v58, %v139_v57  ;;  %v109_v4 = vld [vmem:[%s1171_s1 + $0x2f0] sm:$0xff] }
  0x29   :  { %681 = vmatpush3.bf16.msra.mxu0 %v680_v10  ;;  %v123_v1 = vld [vmem:[%s1171_s1 + $0x360] sm:$0xff]  ;;  %v124_v3 = vld [vmem:[%s1171_s1 + $0x368] sm:$0xff]  ;;  %v110_v5 = vld [vmem:[%s1171_s1 + $0x2f8] sm:$0xff]  ;;  %v700_v8 = vpack.c.bf16 %v92_v0, %v91_v63 }
  0x2a   :  { %683 = vmatprep.subr.bf16.mxu0 %v682_v12  ;;  %v141_v6 = vld [vmem:[%s1171_s1 + $0x3f0] sm:$0xff]  ;;  %v142_v7 = vld [vmem:[%s1171_s1 + $0x3f8] sm:$0xff]  ;;  %v732_v9 = vpack.c.bf16 %v124_v3, %v123_v1  ;;  %v702_v10 = vpack.c.bf16 %v110_v5, %v109_v4 }
  0x2b   :  { %713 = vmatpush3.bf16.msra.mxu1 %v712_v11  ;;  %v93_v11 = vld [vmem:[%s1171_s1 + $0x270] sm:$0xff]  ;;  %v94_v12 = vld [vmem:[%s1171_s1 + $0x278] sm:$0xff]  ;;  %v734_v13 = vpack.c.bf16 %v142_v7, %v141_v6 }
  0x2c   :  { %715 = vmatprep.subr.bf16.mxu1 %v714_v16  ;;  %v125_v14 = vld [vmem:[%s1171_s1 + $0x370] sm:$0xff]  ;;  %v126_v15 = vld [vmem:[%s1171_s1 + $0x378] sm:$0xff]  ;;  %v163_v16 = vsub.s32 4, %v884_v61  ;;  %v704_v17 = vpack.c.bf16 %v94_v12, %v93_v11 }
  0x2d   :  { %685 = vmatpush3.bf16.msra.mxu0 %v684_v23  ;;  %v736_v19 = vpack.c.bf16 %v126_v15, %v125_v14 }
  0x2e   :  { %687 = vmatprep.subr.bf16.mxu0 %v686_v25  ;;  %v164_v21 = vrot.slane %v930_v20, %v163_v16 }
  0x2f   :  { %717 = vmatpush3.bf16.msra.mxu1 %v716_v24  ;;  %v143_v24 = vld [vmem:[%s1173_s2] sm:$0x1] }
  0x30   :  { %719 = vmatprep.subr.bf16.mxu1 %v718_v29 }
  0x31   :  { %689 = vmatpush3.bf16.msra.mxu0 %v688_v35 }
  0x32   :  { %691 = vmatprep.subr.bf16.mxu0 %v690_v37 }
  0x33   :  { %721 = vmatpush3.bf16.msra.mxu1 %v720_v36 }
  0x34   :  { %723 = vmatprep.subr.bf16.mxu1 %v722_v41 }
  0x35   :  { %693 = vmatpush3.bf16.msra.mxu0 %v692_v47 }
  0x36   :  { %695 = vmatprep.subr.bf16.mxu0 %v694_v49 }
  0x37   :  { %725 = vmatpush3.bf16.msra.mxu1 %v724_v48 }
  0x38   :  { %727 = vmatprep.subr.bf16.mxu1 %v726_v53 }
  0x39   :  { %697 = vmatpush3.bf16.msra.mxu0 %v696_v59 }
  0x3a   :  { %699 = vmatprep.subr.bf16.mxu0 %v698_v62 }
  0x3b   :  { %729 = vmatpush3.bf16.msra.mxu1 %v728_v60 }
  0x3c   :  { %731 = vmatprep.subr.bf16.mxu1 %v730_v2 }
  0x3d   :  { %701 = vmatpush3.bf16.msra.mxu0 %v700_v8 }
  0x3e   :  { %703 = vmatprep.subr.bf16.mxu0 %v702_v10 }
  0x3f   :  { %733 = vmatpush3.bf16.msra.mxu1 %v732_v9 }
  0x40   :  { %735 = vmatprep.subr.bf16.mxu1 %v734_v13 }
  0x41   :  { %705 = vmatpush3.bf16.msra.mxu0 %v704_v17 }
  0x43   :  { %737 = vmatpush3.bf16.msra.mxu1 %v736_v19 }
  0x44   :  { %390 = vmatmul.mubr.f32.vlgmr.msra.gmra.mrb[2].mxu0 %v164_v21 }
  0x46   :  { %460 = vmatmul.mubr.f32.vlgmr.msra.gmra.mrb[2].mxu1 %v172_v22 }
  0xf7   :  { %v502_v23 = vpop.f32.mrb[0].mxu0 }
  0xf8   :  { %v503_v25 = vpop.f32.mrb[1].mxu0 }
  0xf9   :  { %v537_v26 = vpop.f32.mrb[0].mxu1  ;;  %v504_v61 = vadd.f32 %v503_v25, %v502_v23 }
  0xfa   :  { %v538_v27 = vpop.f32.mrb[1].mxu1 }
  0xfb   :  { %v539_v28 = vadd.f32 %v538_v27, %v537_v26  ;;  %v252_v29 = vadd.f32 %v504_v61, %v143_v24 }
  0xfd   :  { %v322_v30 = vadd.f32 %v539_v28, %v252_v29 }
 0x117   :  { %v572_v31 = vpop.f32.mrb[2].mxu0 }
 0x118   :  { %v573_v32 = vpop.f32.mrb[3].mxu0 }
 0x119   :  { %v607_v33 = vpop.f32.mrb[2].mxu1  ;;  %v574_v34 = vadd.f32 %v573_v32, %v572_v31 }
 0x11a   :  { %v608_v20 = vpop.f32.mrb[3].mxu1 }
 0x11b   :  { %v609_v35 = vadd.f32 %v608_v20, %v607_v33  ;;  %v392_v36 = vadd.f32 %v574_v34, %v322_v30 }
 0x11d   :  { %v462_v37 = vadd.f32 %v609_v35, %v392_v36 }
 0x11f   :  { %465 = vst [vmem:[%s1174_s3] sm:$0x1] %v462_v37 }

</bundles_post_ra>
